<compile_context>
chip_gen: v5e
topology: v5e:2x2
jax: 0.10.0
libtpu: 0.0.40
codegen_flags: <defaults>
</compile_context>

<pallas_src>
import jax
import jax.numpy as jnp
from jax.experimental import pallas as pl
from jax.experimental.pallas import tpu as pltpu

LANE = 128      # vreg lane width
SUBLANE = 8     # vreg sublane count (f32)


def _round_up(x, m):
    return ((x + m - 1) // m) * m


def _make_mlp_kernel(approximate_gelu: bool):
    """Fused Linear -> GELU -> Linear on one row tile.

    x:  [tm, D_in] f32   (D_in = frame_len; contraction dim, left lane-sparse)
    w1: [D_in, Hp] bf16  b1: [1, Hp] f32   (Hp lane-padded to a multiple of 128)
    w2: [Hp,   Ep] bf16  b2: [1, Ep] f32   (Ep lane-padded to a multiple of 128)
    o:  [tm, Ep]  f32
    """
    def _mlp_kernel(x_ref, w1_ref, b1_ref, w2_ref, b2_ref, o_ref):
        # In-register bf16 cast -> native bf16 MXU path; accumulation stays f32.
        xb = x_ref[...].astype(jnp.bfloat16)
        h = jnp.dot(xb, w1_ref[...], preferred_element_type=jnp.float32)
        h = h + b1_ref[...]                       # bias in f32

        if approximate_gelu:
            # tanh-GELU: uses the EUP slot (otherwise idle in this kernel).
            # Not bit-exact vs torch.nn.GELU() default.
            h = jax.nn.gelu(h, approximate=True)
        else:
            # Exact GELU (erf-based, matches torch.nn.GELU() default). Kept f32.
            inv_sqrt2 = jnp.float32(0.7071067811865476)
            h = 0.5 * h * (1.0 + jax.lax.erf(h * inv_sqrt2))

        o = jnp.dot(h.astype(jnp.bfloat16), w2_ref[...],
                    preferred_element_type=jnp.float32) + b2_ref[...]
        o_ref[...] = o.astype(o_ref.dtype)

    return _mlp_kernel


def mlp_projection_pallas(x_2d, w1, b1, w2, b2, *, max_tm=512,
                          approximate_gelu=False):
    """x_2d: [N, D_in] f32.  w1:[D_in,Hp] bf16, b1:[1,Hp] f32, w2:[Hp,Ep] bf16,
    b2:[1,Ep] f32, with Hp, Ep lane-aligned (multiples of 128).
    Returns [N, Ep] f32 (no row padding / no row slice)."""
    N, D = x_2d.shape
    Hp = w1.shape[1]
    Ep = w2.shape[1]

    # Row tile: as tall as the problem allows (grid steps are a sequential loop,
    # ~0.35 us each).  max_tm=512 is sized for v5e/v6e's 128 MiB VMEM; with
    # bf16 weights + single-buffered residents it also fits v7x's 64 MiB at
    # real Wav2Vec2 dims, but re-sweep there and keep >=2 grid steps so both
    # v7x TensorCores get work (the "parallel" axis shards across them).
    tm = min(max_tm, _round_up(N, SUBLANE))
    grid = (pl.cdiv(N, tm),)   # ragged tail block is masked by Pallas; no pad.

    # Constant index_map -> double buffering is pure VMEM waste; single-buffer.
    resident = pl.Buffered(1)

    flops = 2 * N * D * Hp + 2 * N * Hp * Ep
    bytes_accessed = (
        x_2d.size * x_2d.dtype.itemsize
        + w1.size * w1.dtype.itemsize + b1.size * b1.dtype.itemsize
        + w2.size * w2.dtype.itemsize + b2.size * b2.dtype.itemsize
        + N * Ep * 4)

    # NOTE: at real Wav2Vec2 dims (D=768, H=1536, E=4096) set
    # pltpu.CompilerParams(vmem_limit_bytes=...) explicitly; unnecessary here.
    out = pl.pallas_call(
        _make_mlp_kernel(approximate_gelu),
        out_shape=jax.ShapeDtypeStruct((N, Ep), jnp.float32),
        grid_spec=pltpu.PrefetchScalarGridSpec(
            num_scalar_prefetch=0,
            grid=grid,
            in_specs=[
                pl.BlockSpec((tm, D), lambda i: (i, 0)),    # activation row tile
                pl.BlockSpec((D, Hp), lambda i: (0, 0), pipeline_mode=resident),
                pl.BlockSpec((1, Hp), lambda i: (0, 0), pipeline_mode=resident),
                pl.BlockSpec((Hp, Ep), lambda i: (0, 0), pipeline_mode=resident),
                pl.BlockSpec((1, Ep), lambda i: (0, 0), pipeline_mode=resident),
            ],
            out_specs=pl.BlockSpec((tm, Ep), lambda i: (i, 0)),
        ),
        compiler_params=pltpu.CompilerParams(
            # Independent row axis -> shard grid steps across TensorCores (v7x).
            dimension_semantics=("parallel",)),
        cost_estimate=pl.CostEstimate(
            flops=flops, transcendentals=N * Hp, bytes_accessed=bytes_accessed),
    )(x_2d, w1, b1, w2, b2)

    return out


class Wav2Vec2AudioProjectionPallas:
    """JAX/Pallas port of Wav2Vec2AudioProjection at small synthetic sizes."""

    def __init__(self, key, *, wav2vec_dim=32, embed_dim=64,
                 num_frames=8, frame_len=16, approximate_gelu=False):
        self.wav2vec_dim = wav2vec_dim
        self.embed_dim = embed_dim
        self.num_frames = num_frames
        self.frame_len = frame_len
        self.approximate_gelu = approximate_gelu
        hidden = wav2vec_dim * 2

        k_feat, k_w1, k_b1, k_w2, k_b2 = jax.random.split(key, 5)

        # TODO(synk): the pretrained (frozen) Wav2Vec2Model feature encoder has no
        # Pallas equivalent here; it is replaced by a deterministic frame+linear
        # stand-in producing last_hidden_state of shape [B, S, wav2vec_dim].
        self.feat_w = (jax.random.normal(k_feat, (frame_len, wav2vec_dim),
                                         jnp.float32) * 0.05)

        # MLP parameters (deterministic init) — kept f32 for the reference path.
        self.w1 = jax.random.normal(k_w1, (wav2vec_dim, hidden), jnp.float32) * 0.05
        self.b1 = jax.random.normal(k_b1, (1, hidden), jnp.float32) * 0.01
        self.w2 = jax.random.normal(k_w2, (hidden, embed_dim), jnp.float32) * 0.05
        self.b2 = jax.random.normal(k_b2, (1, embed_dim), jnp.float32) * 0.01

        # --- Kernel-side parameters -------------------------------------------
        # Fold the (frozen) feature projection into the first MLP weight:
        #   (frames @ feat_w) @ w1 == frames @ (feat_w @ w1).
        w1_folded = self.feat_w @ self.w1                     # [frame_len, hidden]

        # Zero-pad hidden / output feature dims to 128 lanes only when needed.
        # Exact: padded hidden channels get b1=0 -> GELU(0)=0 -> padded W2 rows
        # contribute 0.  Real Wav2Vec2 dims (1536 / 3072 / 4096) are already
        # 128-aligned, so these pads and the output slice become no-ops there.
        hp = _round_up(hidden, LANE)
        ep = _round_up(embed_dim, LANE)
        self.hidden_pad = hp
        self.embed_pad = ep

        # Weights in bf16 (half the DMA bytes + resident VMEM, native MXU path);
        # biases stay f32 (added in f32 inside the kernel).
        self.w1_k = jnp.pad(w1_folded,
                            ((0, 0), (0, hp - hidden))).astype(jnp.bfloat16)
        self.b1_k = jnp.pad(self.b1, ((0, 0), (0, hp - hidden)))
        self.w2_k = jnp.pad(self.w2,
                            ((0, hp - hidden), (0, ep - embed_dim))).astype(jnp.bfloat16)
        self.b2_k = jnp.pad(self.b2, ((0, 0), (0, ep - embed_dim)))

    def __call__(self, input_values):
        # input_values: [B, 1, T_audio]  (matches PyTorch NCW audio input)
        B, C, T = input_values.shape
        assert C == 1
        x = jnp.squeeze(input_values, axis=1)                 # [B, T]

        S, F = self.num_frames, self.frame_len
        assert T == S * F
        frames = x.reshape(B * S, F)                          # [N, frame_len]

        # Hot path: single fused Pallas kernel (folded feature proj + MLP).
        out_flat = mlp_projection_pallas(
            frames, self.w1_k, self.b1_k, self.w2_k, self.b2_k,
            approximate_gelu=self.approximate_gelu)

        # Single lane-slice, only when embed_dim is not already 128-aligned.
        if self.embed_pad != self.embed_dim:
            out_flat = out_flat[:, :self.embed_dim]
        return out_flat.reshape(B, S, self.embed_dim)         # [B, S, E]


if __name__ == "__main__":
    key = jax.random.PRNGKey(0)
    k_model, k_input = jax.random.split(key)

    B, T_audio = 2, 128  # B=2 waveforms, 128 samples each
    model = Wav2Vec2AudioProjectionPallas(
        k_model, wav2vec_dim=32, embed_dim=64, num_frames=8, frame_len=16)

    input_values = jax.random.normal(k_input, (B, 1, T_audio), jnp.float32)

    out = model(input_values)
    out = jax.block_until_ready(out)

    assert out.shape == (B, 8, 64), out.shape
    assert out.dtype == jnp.float32

    # Pure-JAX f32 reference of the full (un-folded, un-padded) forward path.
    # Tolerance accounts for the kernel's bf16 weights / bf16 MXU operands
    # (accumulation, biases and GELU are f32).
    frames = jnp.squeeze(input_values, 1).reshape(B, 8, 16)
    hid = frames @ model.feat_w
    ref = (jax.nn.gelu(hid @ model.w1 + model.b1[0], approximate=False)
           @ model.w2 + model.b2[0])
    assert jnp.allclose(out, ref, atol=2e-3, rtol=2e-2)

    print("KERNEL_OK")
</pallas_src>

<mosaic_0001>
module attributes {stable_mosaic.version = 11 : i64} {
  func.func @_mlp_kernel(%arg0: i32, %arg1: memref<16x16xf32, #tpu.memory_space<vmem>>, %arg2: memref<16x128xbf16, #tpu.memory_space<vmem>>, %arg3: memref<1x128xf32, #tpu.memory_space<vmem>>, %arg4: memref<128x128xbf16, #tpu.memory_space<vmem>>, %arg5: memref<1x128xf32, #tpu.memory_space<vmem>>, %arg6: memref<16x128xf32, #tpu.memory_space<vmem>>) attributes {dimension_semantics = [#tpu.dimension_semantics<parallel>], iteration_bounds = array<i64: 1>, scalar_prefetch = 0 : i64, scratch_operands = 0 : i64, tpu.core_type = #tpu.core_type<tc>, window_params = [{transform_indices = @transform_0, window_bounds = array<i64: 16, 16>}, {pipeline_mode = #tpu.pipeline_mode<synchronous>, transform_indices = @transform_1, window_bounds = array<i64: 16, 128>}, {pipeline_mode = #tpu.pipeline_mode<synchronous>, transform_indices = @transform_2, window_bounds = array<i64: 1, 128>}, {pipeline_mode = #tpu.pipeline_mode<synchronous>, transform_indices = @transform_3, window_bounds = array<i64: 128, 128>}, {pipeline_mode = #tpu.pipeline_mode<synchronous>, transform_indices = @transform_4, window_bounds = array<i64: 1, 128>}, {transform_indices = @transform_5, window_bounds = array<i64: 16, 128>}]} {
    %c0 = arith.constant 0 : index
    %c0_0 = arith.constant 0 : index
    %0 = vector.load %arg1[%c0, %c0_0] : memref<16x16xf32, #tpu.memory_space<vmem>>, vector<16x16xf32>
    %1 = arith.truncf %0 : vector<16x16xf32> to vector<16x16xbf16>
    %c0_1 = arith.constant 0 : index
    %c0_2 = arith.constant 0 : index
    %2 = vector.load %arg2[%c0_1, %c0_2] : memref<16x128xbf16, #tpu.memory_space<vmem>>, vector<16x128xbf16>
    %cst = arith.constant dense<0.000000e+00> : vector<16x128xf32>
    %3 = tpu.matmul %1, %2, %cst {dimension_numbers = #tpu.dot_dimension_numbers<[1], [0], [0], [1], [0, 0, 1, 1], [], []>} : vector<16x16xbf16>, vector<16x128xbf16>, vector<16x128xf32> -> vector<16x128xf32>
    %c0_3 = arith.constant 0 : index
    %c0_4 = arith.constant 0 : index
    %4 = vector.load %arg3[%c0_3, %c0_4] : memref<1x128xf32, #tpu.memory_space<vmem>>, vector<1x128xf32>
    %5 = vector.broadcast %4 : vector<1x128xf32> to vector<16x128xf32>
    %6 = arith.addf %3, %5 : vector<16x128xf32>
    %cst_5 = arith.constant 5.000000e-01 : f32
    %7 = vector.broadcast %cst_5 : f32 to vector<16x128xf32>
    %8 = arith.mulf %7, %6 : vector<16x128xf32>
    %cst_6 = arith.constant 0.707106769 : f32
    %9 = vector.broadcast %cst_6 : f32 to vector<16x128xf32>
    %10 = arith.mulf %6, %9 : vector<16x128xf32>
    %11 = math.erf %10 : vector<16x128xf32>
    %cst_7 = arith.constant 1.000000e+00 : f32
    %12 = vector.broadcast %cst_7 : f32 to vector<16x128xf32>
    %13 = arith.addf %12, %11 : vector<16x128xf32>
    %14 = arith.mulf %8, %13 : vector<16x128xf32>
    %15 = arith.truncf %14 : vector<16x128xf32> to vector<16x128xbf16>
    %c0_8 = arith.constant 0 : index
    %c0_9 = arith.constant 0 : index
    %16 = vector.load %arg4[%c0_8, %c0_9] : memref<128x128xbf16, #tpu.memory_space<vmem>>, vector<128x128xbf16>
    %cst_10 = arith.constant dense<0.000000e+00> : vector<16x128xf32>
    %17 = tpu.matmul %15, %16, %cst_10 {dimension_numbers = #tpu.dot_dimension_numbers<[1], [0], [0], [1], [0, 0, 1, 1], [], []>} : vector<16x128xbf16>, vector<128x128xbf16>, vector<16x128xf32> -> vector<16x128xf32>
    %c0_11 = arith.constant 0 : index
    %c0_12 = arith.constant 0 : index
    %18 = vector.load %arg5[%c0_11, %c0_12] : memref<1x128xf32, #tpu.memory_space<vmem>>, vector<1x128xf32>
    %19 = vector.broadcast %18 : vector<1x128xf32> to vector<16x128xf32>
    %20 = arith.addf %17, %19 : vector<16x128xf32>
    %c0_13 = arith.constant 0 : index
    %c0_14 = arith.constant 0 : index
    %21 = vector.load %arg6[%c0_13, %c0_14] : memref<16x128xf32, #tpu.memory_space<vmem>>, vector<16x128xf32>
    tpu.vector_store %arg6[%c0_13, %c0_14], %20 {strides = array<i32>} : memref<16x128xf32, #tpu.memory_space<vmem>>, vector<16x128xf32>,
    return
  }
  func.func @transform_0(%arg0: i32) -> (i32, i32) {
    %c0_i32 = arith.constant 0 : i32
    %c0_i32_0 = arith.constant 0 : i32
    return %arg0, %c0_i32 : i32, i32
  }
  func.func @transform_1(%arg0: i32) -> (i32, i32) {
    %c0_i32 = arith.constant 0 : i32
    %c0_i32_0 = arith.constant 0 : i32
    %c0_i32_1 = arith.constant 0 : i32
    return %c0_i32, %c0_i32_0 : i32, i32
  }
  func.func @transform_2(%arg0: i32) -> (i32, i32) {
    %c0_i32 = arith.constant 0 : i32
    %c0_i32_0 = arith.constant 0 : i32
    %c0_i32_1 = arith.constant 0 : i32
    return %c0_i32, %c0_i32_0 : i32, i32
  }
  func.func @transform_3(%arg0: i32) -> (i32, i32) {
    %c0_i32 = arith.constant 0 : i32
    %c0_i32_0 = arith.constant 0 : i32
    %c0_i32_1 = arith.constant 0 : i32
    return %c0_i32, %c0_i32_0 : i32, i32
  }
  func.func @transform_4(%arg0: i32) -> (i32, i32) {
    %c0_i32 = arith.constant 0 : i32
    %c0_i32_0 = arith.constant 0 : i32
    %c0_i32_1 = arith.constant 0 : i32
    return %c0_i32, %c0_i32_0 : i32, i32
  }
  func.func @transform_5(%arg0: i32) -> (i32, i32) {
    %c0_i32 = arith.constant 0 : i32
    %c0_i32_0 = arith.constant 0 : i32
    return %arg0, %c0_i32 : i32, i32
  }
}

</mosaic_0001>

<bundles_post_ra>
// kernel: tpu_custom_call.1
= control target key start
LH: loop header
LB: loop body
LE: loop exit
PB: predicated region body
PF: predicated region fallthrough
CT: control target
= control target key end

     0   :  { %10 = vsyncpa [#allocation3], 0  ;;  %s539_s0 = inlined_call_operand.hbm [shape: f32[16,16], index: 0, kind: input, shape index: {}]   ;;  %s540_s1 = inlined_call_operand.hbm [shape: bf16[16,128], index: 1, kind: input, shape index: {}]   ;;  %s541_s2 = inlined_call_operand.vmem [shape: f32[1,128], index: 2, kind: input, shape index: {}]   ;;  %s542_s3 = inlined_call_operand.hbm [shape: bf16[128,128], index: 3, kind: input, shape index: {}]   ;;  %s543_s4 = inlined_call_operand.vmem [shape: f32[1,128], index: 4, kind: input, shape index: {}]   ;;  %s544_s5 = inlined_call_operand.hbm [shape: f32[16,128], index: 5, kind: output, shape index: {}]  }
   0x1   :  { %11 = vsyncpa [#allocation6], 0  ;;  %s30_s20 = sshll.u32 %s540_s1, 4  ;;  %s31_s20 = int_to_ptr.hbm [resolvable:$true] %s30_s20 }
   0x2   :  { %12 = vsyncpa [#allocation4], 0  ;;  %s459_s21 = smov [#allocation5]   ;;  %s17_s25 = sshll.u32 %s539_s0, 4  ;;  %s18_s25 = int_to_ptr.hbm [resolvable:$true] %s17_s25 }
   0x3   :  { %s32_s22 = sshll.u32 %s459_s21, 4  ;;  %s460_s26 = smov 64   ;;  %s33_s22 = int_to_ptr.vmem [resolvable:$true] %s32_s22 }
   0x4   :  { %s461_s27 = smov 4   ;;  %s462_s28 = smov [#allocation2]  }
   0x5   :  { %38 = dma.hbm_to_vmem [thread:$0]  %s31_s20, 128, %s33_s22, [#allocation6], %s460_s26, %s460_s26, %s461_s27  }
   0x6   :  { %s19_s29 = sshll.u32 %s462_s28, 4  ;;  %s463_s30 = smov 128   ;;  %s20_s29 = int_to_ptr.vmem [resolvable:$true] %s19_s29 }
   0x7   :  { %s464_s6 = smov 8   ;;  %s45_s8 = sshll.u32 %s542_s3, 4  ;;  %s46_s8 = int_to_ptr.hbm [resolvable:$true] %s45_s8 }
   0x8   :  { %25 = dma.hbm_to_vmem [thread:$0]  %s18_s25, 256, %s20_s29, [#allocation3], %s463_s30, %s463_s30, %s464_s6  }
   0x9   :  { %s465_s9 = smov [#allocation7]  }
   0xa   :  { %s47_s0 = sshll.u32 %s465_s9, 4  ;;  %s48_s0 = int_to_ptr.vmem [resolvable:$true] %s47_s0 }
   0xb   :  { %53 = dma.hbm_to_vmem [thread:$0]  %s46_s8, 1024, %s48_s0, [#allocation6], %s460_s26, %s460_s26, %s461_s27  }
   0xc   :  { %453 = dma.done.wait [#allocation3], 256  }
   0xd   :  { %454 = vsyncadd [#allocation3], 4294967040 }
   0xe   :  { %455 = dma.done.wait [#allocation6], 1152  }
   0xf   :  { %456 = vsyncadd [#allocation6], 4294966144  ;;  %v334_v0 = vld [vmem:[#allocation5] sm:$0xff]  ;;  %v69_v1 = vld [vmem:[#allocation2] sm:$0xff]  ;;  %vm84_vm0 = vcmask 130048   ;;  %s466_s12 = smov [#allocation8]  }
  0x10   :  { %v70_v2 = vld [vmem:[#allocation2 + $0x8] sm:$0xff]  ;;  %95 = vmatpush.bf16.msra.mxu0 %v334_v0  ;;  %v351_v4 = vld [vmem:[%s541_s2] ss:$0 sm:$0xff]  ;;  %v342_v5 = vld [vmem:[#allocation7 + $0x38] sm:$0xff]  ;;  %s279_s13 = sshll.u32 %s466_s12, 4  ;;  %s281_s16 = sshll.u32 %s544_s5, 4  ;;  %s280_s13 = int_to_ptr.vmem [resolvable:$true] %s279_s13  ;;  %s282_s16 = int_to_ptr.hbm [resolvable:$true] %s281_s16 }
  0x11   :  { %v71_v3 = vpack.c.bf16 %v70_v2, %v69_v1  ;;  %259 = vmatpush.bf16.msra.mxu1 %v342_v5  ;;  %v341_v9 = vld [vmem:[#allocation7 + $0x30] sm:$0xff]  ;;  %v340_v11 = vld [vmem:[#allocation7 + $0x28] sm:$0xff]  ;;  %v339_v16 = vld [vmem:[#allocation7 + $0x20] sm:$0xff] }
  0x12   :  { %v338_v22 = vld [vmem:[#allocation7 + $0x18] sm:$0xff]  ;;  %v337_v28 = vld [vmem:[#allocation7 + $0x10] sm:$0xff]  ;;  %v336_v36 = vld [vmem:[#allocation7 + $0x8] sm:$0xff] }
  0x13   :  { %299 = vmatmul.msk.bf16.vlgmr.msra.gmra.mxu0 %vm84_vm0, %v71_v3  ;;  %v335_v43 = vld [vmem:[#allocation7] sm:$0xff] }
  0x15   :  { %260 = vmatpush.bf16.msra.mxu1 %v341_v9 }
  0x19   :  { %261 = vmatpush.bf16.msra.mxu1 %v340_v11 }
  0x1d   :  { %262 = vmatpush.bf16.msra.mxu1 %v339_v16 }
  0x21   :  { %263 = vmatpush.bf16.msra.mxu1 %v338_v22 }
  0x25   :  { %264 = vmatpush.bf16.msra.mxu1 %v337_v28 }
  0x29   :  { %265 = vmatpush.bf16.msra.mxu1 %v336_v36 }
  0x2d   :  { %266 = vmatpush.bf16.msra.mxu1 %v335_v43 }
  0x90   :  { %v97_v6 = vpop.f32.mrf.mxu0 }
  0x91   :  { %v512_v7 = vadd.f32 %v351_v4, %v97_v6 }
  0x93   :  { %v515_v8 = vmul.f32 0.70710677, %v512_v7 }
  0x95   :  { %v106_v10 = vmul.f32 %v515_v8, %v515_v8 }
  0x97   :  { %v107_v12 = vmin.f32 %v106_v10, 16.0 }
  0x98   :  { %v99_v13 = vpop.f32.mrf.mxu0 }
  0x99   :  { %v108_v14 = vmul.f32 2.1237322e-06, %v107_v12  ;;  %v519_v15 = vadd.f32 %v351_v4, %v99_v13  ;;  %v119_v17 = vmul.f32 3.8918573e-05, %v107_v12 }
  0x9b   :  { %v109_v18 = vadd.f32 0.00028619796, %v108_v14  ;;  %v522_v19 = vmul.f32 0.70710677, %v519_v15  ;;  %v120_v20 = vadd.f32 0.001143296, %v119_v17 }
  0x9d   :  { %v146_v21 = vmul.f32 %v522_v19, %v522_v19  ;;  %v110_v23 = vmul.f32 %v109_v18, %v107_v12  ;;  %v121_v24 = vmul.f32 %v120_v20, %v107_v12 }
  0x9f   :  { %v147_v25 = vmin.f32 %v146_v21, 16.0  ;;  %v122_v26 = vadd.f32 0.014752088, %v121_v24  ;;  %v111_v30 = vadd.f32 0.0036580483, %v110_v23 }
  0xa1   :  { %v148_v27 = vmul.f32 2.1237322e-06, %v147_v25  ;;  %v159_v29 = vmul.f32 3.8918573e-05, %v147_v25  ;;  %v123_v31 = vmul.f32 %v122_v26, %v107_v12  ;;  %v112_v38 = vmul.f32 %v111_v30, %v107_v12 }
  0xa2   :  { %v103_v30 = vmul.f32 0.5, %v519_v15 }
  0xa3   :  { %v149_v32 = vadd.f32 0.00028619796, %v148_v27  ;;  %v160_v33 = vadd.f32 0.001143296, %v159_v29  ;;  %v124_v34 = vadd.f32 0.112945676, %v123_v31 }
  0xa4   :  { %v113_v45 = vadd.f32 0.05243302, %v112_v38  ;;  %v102_v29 = vmul.f32 0.5, %v512_v7 }
  0xa5   :  { %v150_v35 = vmul.f32 %v149_v32, %v147_v25  ;;  %v161_v37 = vmul.f32 %v160_v33, %v147_v25  ;;  %v125_v39 = vmul.f32 %v124_v34, %v107_v12 }
  0xa6   :  { %v114_v51 = vmul.f32 %v113_v45, %v107_v12 }
  0xa7   :  { %v151_v40 = vadd.f32 0.0036580483, %v150_v35  ;;  %v162_v41 = vadd.f32 0.014752088, %v161_v37  ;;  %v126_v42 = vadd.f32 0.4994258, %v125_v39 }
  0xa8   :  { %v115_v55 = vadd.f32 0.18741608, %v114_v51 }
  0xa9   :  { %v163_v44 = vmul.f32 %v162_v41, %v147_v25  ;;  %v127_v46 = vmul.f32 %v126_v42, %v107_v12  ;;  %v152_v47 = vmul.f32 %v151_v40, %v147_v25 }
  0xaa   :  { %v116_v60 = vmul.f32 %v115_v55, %v107_v12 }
  0xab   :  { %v164_v48 = vadd.f32 0.112945676, %v163_v44  ;;  %v128_v49 = vadd.f32 1.0, %v127_v46  ;;  %v153_v52 = vadd.f32 0.05243302, %v152_v47 }
  0xac   :  { %v117_v2 = vadd.f32 1.1283791, %v116_v60 }
  0xad   :  { %v165_v50 = vmul.f32 %v164_v48, %v147_v25  ;;  %353 = vrcp.f32 %v128_v49  ;;  %v154_v56 = vmul.f32 %v153_v52, %v147_v25  ;;  %v140_v63 = vand.u32 2147483648, %v128_v49 }
  0xae   :  { %v138_v1 = vand.u32 2147483647, %v128_v49  ;;  %vm134_vm2 = vweird.f32 %v128_v49  ;;  %v118_v11 = vmul.f32 %v117_v2, %v515_v8 }
  0xaf   :  { %v166_v53 = vadd.f32 0.4994258, %v165_v50  ;;  %v155_v61 = vadd.f32 0.18741608, %v154_v56  ;;  %v141_v6 = vor.u32 1.1754944e-38, %v140_v63 }
  0xb0   :  { %vm139_vm4 = vcmp.eq.f32.partialorder %v138_v1, 8.507059e+37 }
  0xb1   :  { %v167_v54 = vmul.f32 %v166_v53, %v147_v25  ;;  %v156_v4 = vmul.f32 %v155_v61, %v147_v25 }
  0xb3   :  { %v168_v57 = vadd.f32 1.0, %v167_v54  ;;  %v354_v58 = vpop.eup %353  ;;  %v157_v14 = vadd.f32 1.1283791, %v156_v4 }
  0xb4   :  { %v130_v59 = vmul.f32 %v354_v58, %v128_v49  ;;  %vm135_vm1 = vweird.f32 %v354_v58 }
  0xb5   :  { %355 = vrcp.f32 %v168_v57  ;;  %vm136_vm3 = vmor %vm134_vm2, %vm135_vm1  ;;  %v180_v16 = vand.u32 2147483648, %v168_v57  ;;  %v178_v20 = vand.u32 2147483647, %v168_v57  ;;  %vm174_vm6 = vweird.f32 %v168_v57 }
  0xb6   :  { %v131_v62 = vsub.f32 1.0, %v130_v59  ;;  %v158_v23 = vmul.f32 %v157_v14, %v522_v19  ;;  %v352_v19 = vld [vmem:[%s543_s4] ss:$0 sm:$0xff] }
  0xb7   :  { %v181_v22 = vor.u32 1.1754944e-38, %v180_v16  ;;  %vm179_vm8 = vcmp.eq.f32.partialorder %v178_v20, 8.507059e+37 }
  0xb8   :  { %v132_v0 = vmul.f32 %v354_v58, %v131_v62 }
  0xba   :  { %v133_v5 = vadd.f32 %v354_v58, %v132_v0 }
  0xbb   :  { %v356_v3 = vpop.eup %355 }
  0xbc   :  { %v170_v9 = vmul.f32 %v356_v3, %v168_v57  ;;  %v137_v10 = vsel %vm136_vm3, %v354_v58, %v133_v5  ;;  %vm175_vm5 = vweird.f32 %v356_v3 }
  0xbd   :  { %v142_v13 = vsel %vm139_vm4, %v141_v6, %v137_v10  ;;  %vm176_vm7 = vmor %vm174_vm6, %vm175_vm5 }
  0xbe   :  { %v171_v12 = vsub.f32 1.0, %v170_v9  ;;  %v143_v17 = vmul.f32 %v142_v13, %v118_v11 }
  0xc0   :  { %v172_v18 = vmul.f32 %v356_v3, %v171_v12  ;;  %v300_v24 = vclamps-f32 %v143_v17, 1.0 }
  0xc2   :  { %v173_v21 = vadd.f32 %v356_v3, %v172_v18  ;;  %v186_v28 = vadd.f32 1.0, %v300_v24 }
  0xc4   :  { %v177_v25 = vsel %vm176_vm7, %v356_v3, %v173_v21  ;;  %v188_v32 = vmul.f32 %v186_v28, %v102_v29 }
  0xc5   :  { %v182_v26 = vsel %vm179_vm8, %v181_v22, %v177_v25 }
  0xc6   :  { %v183_v27 = vmul.f32 %v182_v26, %v158_v23 }
  0xc8   :  { %v301_v8 = vclamps-f32 %v183_v27, 1.0 }
  0xca   :  { %v187_v31 = vadd.f32 1.0, %v301_v8 }
  0xcc   :  { %v189_v33 = vmul.f32 %v187_v31, %v103_v30 }
  0xce   :  { %v190_v34 = vpack.c.bf16 %v189_v33, %v188_v32 }
  0xd0   :  { %267 = vmatmul.bf16.vlgmr.msra.gmra.mxu1 %v190_v34 }
 0x14d   :  { %v268_v35 = vpop.f32.mrf.mxu1 }
 0x14e   :  { %v269_v36 = vadd.f32 %v352_v19, %v268_v35 }
 0x150   :  { %273 = vst [vmem:[#allocation8] sm:$0xff] %v269_v36 }
 0x155   :  { %v270_v7 = vpop.f32.mrf.mxu1 }
 0x156   :  { %v271_v15 = vadd.f32 %v352_v19, %v270_v7 }
 0x158   :  { %274 = vst [vmem:[#allocation8 + $0x8] sm:$0xff] %v271_v15 }
 0x159   :  { %287 = dma.vmem_to_hbm [thread:$0]  %s280_s13, 256, %s282_s16, [#allocation4], %s463_s30, %s463_s30, %s464_s6  }
 0x15a   :  { %457 = dma.done.wait [#allocation4], 256  }
 0x15b   :  { %458 = vsyncadd [#allocation4], 4294967040 }
 0x15c   :  { %292 = vsyncpa [#allocation3], 1 }
 0x15d   :  { %293 = vsyncpa [#allocation6], 1 }
 0x15e   :  { %294 = vsyncpa [#allocation4], 1 }

</bundles_post_ra>
